<compile_context>
chip_gen: v7x
topology: tpu7x:2x2x1
jax: 0.10.0
libtpu: 0.0.40
codegen_flags: <defaults>
</compile_context>

<pallas_src>
import jax
import jax.numpy as jnp
from jax.experimental import pallas as pl
from jax.experimental.pallas import tpu as pltpu

NUM_FEATURE = 2200   # D2Deep input feature count
H_PAD = 128          # lane-padded hidden width (covers hidden and hidden2)
EPS = 1e-5           # nn.BatchNorm1d default eps


def _round_up(n, m):
    return ((n + m - 1) // m) * m


def _make_kernel(b_real: int, b_pad: int, tile_b: int, fin_chunk: int):
    """Build the kernel with the real/padded batch sizes baked in."""
    inv_b = 1.0 / float(b_real)
    n_chunks = b_pad // fin_chunk
    need_mask = (b_real != b_pad)           # padded batch rows exist
    c_align = 128 if fin_chunk % 128 == 0 else 8
    t_align = 128 if tile_b % 128 == 0 else 8

    def kernel(x_ref,
               w1_ref, g1_ref, be1_ref,
               w2_ref, g2_ref, be2_ref,
               w3t_ref, b3_ref,
               o_ref,
               h1_ref, sum1_ref):
        i = pl.program_id(0)

        @pl.when(i == 0)
        def _init():
            sum1_ref[...] = jnp.zeros_like(sum1_ref)

        # ---- layer_1 on this batch tile (bf16 MXU inputs, f32 accumulate) ----
        # b1 omitted: exactly cancelled by training-mode BN mean subtraction.
        x_tile = x_ref[...].astype(jnp.bfloat16)                  # [tile_b, 2200]
        h1 = jnp.dot(x_tile, w1_ref[...],
                     preferred_element_type=jnp.float32)          # [tile_b, H_PAD]

        row0 = pl.multiple_of(i * tile_b, t_align)
        h1_ref[pl.ds(row0, tile_b), :] = h1.astype(h1_ref.dtype)  # resident pre-BN h1
        sum1_ref[...] += jnp.sum(h1, axis=0, keepdims=True)       # BN1 mean stats

        # ---- last tile: chunked BN1 -> ReLU -> layer_2 -> BN2 -> ReLU -> layer_3 ----
        @pl.when(i == pl.num_programs(0) - 1)
        def _finalize():
            def chunk(c):
                r0 = pl.multiple_of(c * fin_chunk, c_align)
                return r0, h1_ref[pl.ds(r0, fin_chunk), :].astype(jnp.float32)

            def mask_rows(r0, v):
                # zero padded batch rows so they do not pollute BN statistics
                if not need_mask:
                    return v
                rows = r0 + jax.lax.broadcasted_iota(jnp.int32, v.shape, 0)
                return jnp.where(rows < b_real, v, 0.0)

            # --- BN1: mean from the running sum, variance via a centered
            # second pass over the resident h1 (no E[x^2]-m^2 cancellation) ---
            mean1 = sum1_ref[...] * inv_b                          # [1, H_PAD]

            def var1_body(c, acc):
                r0, hc = chunk(c)
                d = mask_rows(r0, hc - mean1)
                return acc + jnp.sum(d * d, axis=0, keepdims=True)

            var1 = jax.lax.fori_loop(0, n_chunks, var1_body,
                                     jnp.zeros_like(mean1)) * inv_b
            scale1 = g1_ref[...] * jax.lax.rsqrt(var1 + EPS)       # fused BN affine
            shift1 = be1_ref[...] - mean1 * scale1

            # --- pass A: BN1+ReLU -> layer_2 per chunk; overwrite the h1
            # scratch with h2 (reuse) and accumulate the BN2 sum ---
            w2 = w2_ref[...]                                       # [H_PAD, H_PAD] bf16

            def passA_body(c, sum2):
                r0, hc = chunk(c)
                a1 = mask_rows(r0, jnp.maximum(hc * scale1 + shift1, 0.0))
                h2 = jnp.dot(a1.astype(jnp.bfloat16), w2,
                             preferred_element_type=jnp.float32)   # [chunk, H_PAD]
                h1_ref[pl.ds(r0, fin_chunk), :] = h2.astype(h1_ref.dtype)
                return sum2 + jnp.sum(h2, axis=0, keepdims=True)

            sum2 = jax.lax.fori_loop(0, n_chunks, passA_body, jnp.zeros_like(mean1))
            mean2 = sum2 * inv_b

            # --- BN2 variance: centered second pass over the resident h2 ---
            def var2_body(c, acc):
                r0, hc = chunk(c)
                d = mask_rows(r0, hc - mean2)
                return acc + jnp.sum(d * d, axis=0, keepdims=True)

            var2 = jax.lax.fori_loop(0, n_chunks, var2_body,
                                     jnp.zeros_like(mean2)) * inv_b
            scale2 = g2_ref[...] * jax.lax.rsqrt(var2 + EPS)
            shift2 = be2_ref[...] - mean2 * scale2

            # --- pass B: BN2+ReLU -> layer_3, emitted lane-dense (batch in
            # lanes): w3t[8,H_PAD] x a2[chunk,H_PAD]^T -> [8, chunk], row 0 real ---
            w3t = w3t_ref[...]                                     # [8, H_PAD] f32
            b3 = b3_ref[...]                                       # [1, 1]

            def passB_body(c, carry):
                r0, hc = chunk(c)
                a2 = jnp.maximum(hc * scale2 + shift2, 0.0)
                outs = jax.lax.dot_general(
                    w3t, a2, (((1,), (1,)), ((), ())),
                    preferred_element_type=jnp.float32)            # [8, chunk]
                o_ref[pl.ds(c, 1), :] = (outs[0:1, :] + b3).astype(o_ref.dtype)
                return carry

            jax.lax.fori_loop(0, n_chunks, passB_body, jnp.int32(0))

    return kernel


def classifier2l_forward(x, params, *, tile_b=None, h1_dtype=jnp.float32):
    """x: [B, 2200] (bf16 strongly recommended; f32 accepted and cast in-kernel);
    params: dict from init_params (lane-padded).  Returns [B, 1] f32 logits."""
    B, F = x.shape
    assert F == NUM_FEATURE

    # hardware-aware defaults: VMEM capacity drives tile size and the limit
    try:
        vmem_cap = int(pltpu.get_tpu_info().vmem_capacity_bytes)
    except Exception:
        vmem_cap = 128 << 20
    if tile_b is None:
        # 128-MiB-VMEM parts (v5e/v6e): big tiles amortize per-step overhead
        # and lengthen the x DMAs.  64-MiB parts (v7x): leave room for h1.
        tile_b = 1024 if vmem_cap >= (96 << 20) else 512

    tile_b = max(8, min(_round_up(tile_b, 8), _round_up(B, 8)))
    B_pad = _round_up(B, tile_b)
    if B_pad != B:
        # padded rows are exactly zero -> they contribute 0 to the BN1 sum
        x = jnp.pad(x, ((0, B_pad - B), (0, 0)))
    grid = (B_pad // tile_b,)

    # finalize chunk: bounded live data; divides B_pad because it divides tile_b
    fin_chunk = 512 if tile_b % 512 == 0 else tile_b
    n_out_rows = B_pad // fin_chunk

    w1, g1, be1 = params["w1"], params["g1"], params["be1"]
    w2, g2, be2 = params["w2"], params["g2"], params["be2"]
    w3t, b3 = params["w3t"], params["b3"]

    def const_spec(shape):
        nd = len(shape)
        return pl.BlockSpec(shape, lambda i, _nd=nd: (0,) * _nd)   # grid-invariant
        # (left at default double-buffering; pl.Buffered(1) would save ~0.6 MiB)

    in_specs = [
        pl.BlockSpec((tile_b, NUM_FEATURE), lambda i: (i, 0)),     # streamed x tiles
        const_spec(w1.shape), const_spec(g1.shape), const_spec(be1.shape),
        const_spec(w2.shape), const_spec(g2.shape), const_spec(be2.shape),
        const_spec(w3t.shape), const_spec(b3.shape),
    ]

    # VMEM budget: x double-buffer + resident h1/h2 + weights (x2) +
    # lane-dense output (x2) + finalize-chunk / misc headroom.
    h1_dt = jnp.dtype(h1_dtype)
    est = (2 * tile_b * NUM_FEATURE * x.dtype.itemsize
           + B_pad * H_PAD * h1_dt.itemsize
           + 2 * (w1.size * w1.dtype.itemsize + w2.size * w2.dtype.itemsize)
           + 2 * _round_up(n_out_rows, 8) * _round_up(fin_chunk, 128) * 4
           + (6 << 20))
    vmem_limit = int(min(max(est, 32 << 20), vmem_cap - (16 << 20)))

    out = pl.pallas_call(
        _make_kernel(B, B_pad, tile_b, fin_chunk),
        out_shape=jax.ShapeDtypeStruct((n_out_rows, fin_chunk), jnp.float32),
        grid_spec=pltpu.PrefetchScalarGridSpec(
            num_scalar_prefetch=0,
            grid=grid,
            in_specs=in_specs,
            out_specs=pl.BlockSpec((n_out_rows, fin_chunk), lambda i: (0, 0)),
            scratch_shapes=[
                pltpu.VMEM((B_pad, H_PAD), h1_dt),     # resident pre-BN h1 (reused for h2)
                pltpu.VMEM((1, H_PAD), jnp.float32),   # BN1 running sum
            ],
        ),
        compiler_params=pltpu.CompilerParams(
            dimension_semantics=("arbitrary",),        # BN reduction over batch tiles
            vmem_limit_bytes=vmem_limit,
        ),
    )(x, w1, g1, be1, w2, g2, be2, w3t, b3)
    return out.reshape(-1)[:B].reshape(B, 1)


def init_params(key, hidden, hidden2):
    """Synthetic parameters (PyTorch-Linear-style init), lane-padded for the kernel."""
    assert hidden <= H_PAD and hidden2 <= H_PAD
    ks = jax.random.split(key, 10)

    def linear(kw, kb, fan_in, fan_out):
        bound = float(fan_in) ** -0.5
        w = jax.random.uniform(kw, (fan_in, fan_out), jnp.float32, -bound, bound)
        b = jax.random.uniform(kb, (1, fan_out), jnp.float32, -bound, bound)
        return w, b

    w1, b1 = linear(ks[0], ks[1], NUM_FEATURE, hidden)
    w2, b2 = linear(ks[2], ks[3], hidden, hidden2)
    w3, b3 = linear(ks[4], ks[5], hidden2, 1)
    g1 = jax.random.uniform(ks[6], (1, hidden), jnp.float32, 0.5, 1.5)
    be1 = jax.random.uniform(ks[7], (1, hidden), jnp.float32, -0.5, 0.5)
    g2 = jax.random.uniform(ks[8], (1, hidden2), jnp.float32, 0.5, 1.5)
    be2 = jax.random.uniform(ks[9], (1, hidden2), jnp.float32, -0.5, 0.5)

    def pad_c(a, n):  # zero-pad last dim to n lanes
        return jnp.pad(a, ((0, 0), (0, n - a.shape[1])))

    def pad_r(a, n):  # zero-pad first dim to n
        return jnp.pad(a, ((0, n - a.shape[0]), (0, 0)))

    w3t_row = pad_c(w3.T, H_PAD)                                   # [1, 128]
    w3t8 = jnp.pad(w3t_row, ((0, 7), (0, 0)))                      # [8, 128], row 0 real

    return {
        # kernel-side params (hidden dims padded to 128; matmul weights in bf16)
        "w1": pad_c(w1, H_PAD).astype(jnp.bfloat16),               # [2200, 128]
        "g1": pad_c(g1, H_PAD), "be1": pad_c(be1, H_PAD),          # [1, 128]
        "w2": pad_r(pad_c(w2, H_PAD), H_PAD).astype(jnp.bfloat16),  # [128, 128]
        "g2": pad_c(g2, H_PAD), "be2": pad_c(be2, H_PAD),          # [1, 128]
        "w3t": w3t8,                                               # [8, 128] f32
        "b3": b3,                                                  # [1, 1]
        # reference-only (dropped in kernel: exactly cancelled by batch-stat BN)
        "b1": b1, "b2": b2,
        "hidden": hidden, "hidden2": hidden2,
    }


def _reference(x, p):
    """Pure-JAX reference of the PyTorch forward (training-mode BN, dropout=0),
    using the same bf16 matmul inputs / f32 accumulation as the kernel."""
    h, h2n = p["hidden"], p["hidden2"]
    w1, g1, be1, b1 = p["w1"][:, :h], p["g1"][:, :h], p["be1"][:, :h], p["b1"]
    w2 = p["w2"][:h, :h2n]
    g2, be2, b2 = p["g2"][:, :h2n], p["be2"][:, :h2n], p["b2"]
    w3, b3 = p["w3t"][0:1, :h2n].T, p["b3"]

    def bn(t, g, be):
        m = jnp.mean(t, axis=0, keepdims=True)
        v = jnp.mean((t - m) * (t - m), axis=0, keepdims=True)     # biased, centered
        s = g * jax.lax.rsqrt(v + EPS)
        return t * s + (be - m * s)

    t = jnp.dot(x.astype(jnp.bfloat16), w1, preferred_element_type=jnp.float32) + b1
    t = jnp.maximum(bn(t, g1, be1), 0.0)
    t = jnp.dot(t.astype(jnp.bfloat16), w2, preferred_element_type=jnp.float32) + b2
    t = jnp.maximum(bn(t, g2, be2), 0.0)
    return jnp.dot(t, w3, preferred_element_type=jnp.float32) + b3


if __name__ == "__main__":
    HIDDEN, HIDDEN2 = 32, 16
    key = jax.random.PRNGKey(0)
    kx1, kx2, kx3, kp = jax.random.split(key, 4)
    params = init_params(kp, HIDDEN, HIDDEN2)

    # The producer hands over x in bf16: halves the dominant HBM stream.
    # case 1: small batch, single tile, default tile size
    B1 = 8
    x1 = jax.random.normal(kx1, (B1, NUM_FEATURE), jnp.float32).astype(jnp.bfloat16)
    out1 = jax.block_until_ready(classifier2l_forward(x1, params))
    ref1 = _reference(x1, params)
    assert out1.shape == (B1, 1)
    assert jnp.allclose(out1, ref1, atol=5e-3, rtol=5e-3)

    # case 2: batch not a multiple of the tile -> multi-tile pipeline,
    # BN accumulation across tiles, padded-row masking, chunked finalize
    B2 = 20
    x2 = jax.random.normal(kx2, (B2, NUM_FEATURE), jnp.float32).astype(jnp.bfloat16)
    out2 = jax.block_until_ready(classifier2l_forward(x2, params, tile_b=8))
    ref2 = _reference(x2, params)
    assert out2.shape == (B2, 1)
    assert jnp.allclose(out2, ref2, atol=5e-3, rtol=5e-3)

    # case 3: multi-tile + multi-chunk finalize with 128-wide lane-dense output
    B3 = 300
    x3 = jax.random.normal(kx3, (B3, NUM_FEATURE), jnp.float32).astype(jnp.bfloat16)
    out3 = jax.block_until_ready(classifier2l_forward(x3, params, tile_b=128))
    ref3 = _reference(x3, params)
    assert out3.shape == (B3, 1)
    assert jnp.allclose(out3, ref3, atol=5e-3, rtol=5e-3)

    print("KERNEL_OK")
</pallas_src>

<mosaic_0001>
module attributes {stable_mosaic.version = 11 : i64} {
  func.func @kernel(%arg0: i32, %arg1: memref<8x2200xbf16, #tpu.memory_space<vmem>>, %arg2: memref<2200x128xbf16, #tpu.memory_space<vmem>>, %arg3: memref<1x128xf32, #tpu.memory_space<vmem>>, %arg4: memref<1x128xf32, #tpu.memory_space<vmem>>, %arg5: memref<128x128xbf16, #tpu.memory_space<vmem>>, %arg6: memref<1x128xf32, #tpu.memory_space<vmem>>, %arg7: memref<1x128xf32, #tpu.memory_space<vmem>>, %arg8: memref<8x128xf32, #tpu.memory_space<vmem>>, %arg9: memref<1x1xf32, #tpu.memory_space<vmem>>, %arg10: memref<1x8xf32, #tpu.memory_space<vmem>>, %arg11: memref<8x128xf32, #tpu.memory_space<vmem>>, %arg12: memref<1x128xf32, #tpu.memory_space<vmem>>) attributes {dimension_semantics = [#tpu.dimension_semantics<arbitrary>], iteration_bounds = array<i64: 1>, scalar_prefetch = 0 : i64, scratch_operands = 2 : i64, tpu.core_type = #tpu.core_type<tc>, window_params = [{transform_indices = @transform_0, window_bounds = array<i64: 8, 2200>}, {pipeline_mode = #tpu.pipeline_mode<synchronous>, transform_indices = @transform_1, window_bounds = array<i64: 2200, 128>}, {pipeline_mode = #tpu.pipeline_mode<synchronous>, transform_indices = @transform_2, window_bounds = array<i64: 1, 128>}, {pipeline_mode = #tpu.pipeline_mode<synchronous>, transform_indices = @transform_3, window_bounds = array<i64: 1, 128>}, {pipeline_mode = #tpu.pipeline_mode<synchronous>, transform_indices = @transform_4, window_bounds = array<i64: 128, 128>}, {pipeline_mode = #tpu.pipeline_mode<synchronous>, transform_indices = @transform_5, window_bounds = array<i64: 1, 128>}, {pipeline_mode = #tpu.pipeline_mode<synchronous>, transform_indices = @transform_6, window_bounds = array<i64: 1, 128>}, {pipeline_mode = #tpu.pipeline_mode<synchronous>, transform_indices = @transform_7, window_bounds = array<i64: 8, 128>}, {pipeline_mode = #tpu.pipeline_mode<synchronous>, transform_indices = @transform_8, window_bounds = array<i64: 1, 1>}, {pipeline_mode = #tpu.pipeline_mode<synchronous>, transform_indices = @transform_9, window_bounds = array<i64: 1, 8>}]} {
    %c0_i32 = arith.constant 0 : i32
    %0 = arith.cmpi eq, %arg0, %c0_i32 : i32
    %1 = arith.extui %0 : i1 to i32
    %c0_i32_0 = arith.constant 0 : i32
    %2 = arith.cmpi ne, %1, %c0_i32_0 : i32
    scf.if %2 {
      %cst_12 = arith.constant 0.000000e+00 : f32
      %18 = vector.broadcast %cst_12 : f32 to vector<1x128xf32>
      %c0_13 = arith.constant 0 : index
      %c0_14 = arith.constant 0 : index
      %19 = vector.load %arg12[%c0_13, %c0_14] : memref<1x128xf32, #tpu.memory_space<vmem>>, vector<1x128xf32>
      tpu.vector_store %arg12[%c0_13, %c0_14], %18 {strides = array<i32>} : memref<1x128xf32, #tpu.memory_space<vmem>>, vector<1x128xf32>,
    } else {
    }
    %c0 = arith.constant 0 : index
    %c0_1 = arith.constant 0 : index
    %3 = vector.load %arg1[%c0, %c0_1] : memref<8x2200xbf16, #tpu.memory_space<vmem>>, vector<8x2200xbf16>
    %c0_2 = arith.constant 0 : index
    %c0_3 = arith.constant 0 : index
    %4 = vector.load %arg2[%c0_2, %c0_3] : memref<2200x128xbf16, #tpu.memory_space<vmem>>, vector<2200x128xbf16>
    %cst = arith.constant dense<0.000000e+00> : vector<8x128xf32>
    %5 = tpu.matmul %3, %4, %cst {dimension_numbers = #tpu.dot_dimension_numbers<[1], [0], [0], [1], [0, 0, 1, 1], [], []>} : vector<8x2200xbf16>, vector<2200x128xbf16>, vector<8x128xf32> -> vector<8x128xf32>
    %c8_i32 = arith.constant 8 : i32
    %6 = arith.muli %arg0, %c8_i32 : i32
    %7 = tpu.assume_multiple %6, 8 : i32
    %8 = arith.index_cast %7 : i32 to index
    %c0_4 = arith.constant 0 : index
    %9 = vector.load %arg11[%8, %c0_4] : memref<8x128xf32, #tpu.memory_space<vmem>>, vector<8x128xf32>
    tpu.vector_store %arg11[%8, %c0_4], %5 {strides = array<i32>} : memref<8x128xf32, #tpu.memory_space<vmem>>, vector<8x128xf32>,
    %c0_5 = arith.constant 0 : index
    %c0_6 = arith.constant 0 : index
    %10 = vector.load %arg12[%c0_5, %c0_6] : memref<1x128xf32, #tpu.memory_space<vmem>>, vector<1x128xf32>
    %cst_7 = arith.constant dense<0.000000e+00> : vector<128xf32>
    %11 = vector.multi_reduction <add>, %5, %cst_7 [0] : vector<8x128xf32> to vector<128xf32>
    %12 = vector.shape_cast %11 : vector<128xf32> to vector<1x128xf32>
    %13 = arith.addf %10, %12 : vector<1x128xf32>
    %c0_8 = arith.constant 0 : index
    %c0_9 = arith.constant 0 : index
    %14 = vector.load %arg12[%c0_8, %c0_9] : memref<1x128xf32, #tpu.memory_space<vmem>>, vector<1x128xf32>
    tpu.vector_store %arg12[%c0_8, %c0_9], %13 {strides = array<i32>} : memref<1x128xf32, #tpu.memory_space<vmem>>, vector<1x128xf32>,
    %c0_i32_10 = arith.constant 0 : i32
    %15 = arith.cmpi eq, %arg0, %c0_i32_10 : i32
    %16 = arith.extui %15 : i1 to i32
    %c0_i32_11 = arith.constant 0 : i32
    %17 = arith.cmpi ne, %16, %c0_i32_11 : i32
    scf.if %17 {
      %c0_12 = arith.constant 0 : index
      %c0_13 = arith.constant 0 : index
      %18 = vector.load %arg12[%c0_12, %c0_13] : memref<1x128xf32, #tpu.memory_space<vmem>>, vector<1x128xf32>
      %cst_14 = arith.constant 1.250000e-01 : f32
      %19 = vector.broadcast %cst_14 : f32 to vector<1x128xf32>
      %20 = arith.mulf %18, %19 : vector<1x128xf32>
      %cst_15 = arith.constant 0.000000e+00 : f32
      %21 = vector.broadcast %cst_15 : f32 to vector<1x128xf32>
      %c0_i32_16 = arith.constant 0 : i32
      %c8_i32_17 = arith.constant 8 : i32
      %22 = arith.muli %c0_i32_16, %c8_i32_17 : i32
      %23 = tpu.assume_multiple %22, 8 : i32
      %24 = arith.index_cast %23 : i32 to index
      %c0_18 = arith.constant 0 : index
      %25 = vector.load %arg11[%24, %c0_18] : memref<8x128xf32, #tpu.memory_space<vmem>>, vector<8x128xf32>
      %26 = vector.broadcast %20 : vector<1x128xf32> to vector<8x128xf32>
      %27 = arith.subf %25, %26 : vector<8x128xf32>
      %28 = arith.mulf %27, %27 : vector<8x128xf32>
      %cst_19 = arith.constant dense<0.000000e+00> : vector<128xf32>
      %29 = vector.multi_reduction <add>, %28, %cst_19 [0] : vector<8x128xf32> to vector<128xf32>
      %30 = vector.shape_cast %29 : vector<128xf32> to vector<1x128xf32>
      %31 = arith.addf %21, %30 : vector<1x128xf32>
      %c1_i32 = arith.constant 1 : i32
      %cst_20 = arith.constant 1.250000e-01 : f32
      %32 = vector.broadcast %cst_20 : f32 to vector<1x128xf32>
      %33 = arith.mulf %31, %32 : vector<1x128xf32>
      %c0_21 = arith.constant 0 : index
      %c0_22 = arith.constant 0 : index
      %34 = vector.load %arg3[%c0_21, %c0_22] : memref<1x128xf32, #tpu.memory_space<vmem>>, vector<1x128xf32>
      %cst_23 = arith.constant 9.99999974E-6 : f32
      %35 = vector.broadcast %cst_23 : f32 to vector<1x128xf32>
      %36 = arith.addf %33, %35 : vector<1x128xf32>
      %37 = math.rsqrt %36 : vector<1x128xf32>
      %38 = arith.mulf %34, %37 : vector<1x128xf32>
      %c0_24 = arith.constant 0 : index
      %c0_25 = arith.constant 0 : index
      %39 = vector.load %arg4[%c0_24, %c0_25] : memref<1x128xf32, #tpu.memory_space<vmem>>, vector<1x128xf32>
      %40 = arith.mulf %20, %38 : vector<1x128xf32>
      %41 = arith.subf %39, %40 : vector<1x128xf32>
      %c0_26 = arith.constant 0 : index
      %c0_27 = arith.constant 0 : index
      %42 = vector.load %arg5[%c0_26, %c0_27] : memref<128x128xbf16, #tpu.memory_space<vmem>>, vector<128x128xbf16>
      %cst_28 = arith.constant 0.000000e+00 : f32
      %43 = vector.broadcast %cst_28 : f32 to vector<1x128xf32>
      %c0_i32_29 = arith.constant 0 : i32
      %c8_i32_30 = arith.constant 8 : i32
      %44 = arith.muli %c0_i32_29, %c8_i32_30 : i32
      %45 = tpu.assume_multiple %44, 8 : i32
      %46 = arith.index_cast %45 : i32 to index
      %c0_31 = arith.constant 0 : index
      %47 = vector.load %arg11[%46, %c0_31] : memref<8x128xf32, #tpu.memory_space<vmem>>, vector<8x128xf32>
      %48 = vector.broadcast %38 : vector<1x128xf32> to vector<8x128xf32>
      %49 = arith.mulf %47, %48 : vector<8x128xf32>
      %50 = vector.broadcast %41 : vector<1x128xf32> to vector<8x128xf32>
      %51 = arith.addf %49, %50 : vector<8x128xf32>
      %cst_32 = arith.constant 0.000000e+00 : f32
      %52 = vector.broadcast %cst_32 : f32 to vector<8x128xf32>
      %53 = arith.maximumf %51, %52 : vector<8x128xf32>
      %54 = arith.truncf %53 : vector<8x128xf32> to vector<8x128xbf16>
      %cst_33 = arith.constant dense<0.000000e+00> : vector<8x128xf32>
      %55 = tpu.matmul %54, %42, %cst_33 {dimension_numbers = #tpu.dot_dimension_numbers<[1], [0], [0], [1], [0, 0, 1, 1], [], []>} : vector<8x128xbf16>, vector<128x128xbf16>, vector<8x128xf32> -> vector<8x128xf32>
      %56 = arith.index_cast %45 : i32 to index
      %c0_34 = arith.constant 0 : index
      %57 = vector.load %arg11[%56, %c0_34] : memref<8x128xf32, #tpu.memory_space<vmem>>, vector<8x128xf32>
      tpu.vector_store %arg11[%56, %c0_34], %55 {strides = array<i32>} : memref<8x128xf32, #tpu.memory_space<vmem>>, vector<8x128xf32>,
      %cst_35 = arith.constant dense<0.000000e+00> : vector<128xf32>
      %58 = vector.multi_reduction <add>, %55, %cst_35 [0] : vector<8x128xf32> to vector<128xf32>
      %59 = vector.shape_cast %58 : vector<128xf32> to vector<1x128xf32>
      %60 = arith.addf %43, %59 : vector<1x128xf32>
      %c1_i32_36 = arith.constant 1 : i32
      %cst_37 = arith.constant 1.250000e-01 : f32
      %61 = vector.broadcast %cst_37 : f32 to vector<1x128xf32>
      %62 = arith.mulf %60, %61 : vector<1x128xf32>
      %cst_38 = arith.constant 0.000000e+00 : f32
      %63 = vector.broadcast %cst_38 : f32 to vector<1x128xf32>
      %c0_i32_39 = arith.constant 0 : i32
      %c8_i32_40 = arith.constant 8 : i32
      %64 = arith.muli %c0_i32_39, %c8_i32_40 : i32
      %65 = tpu.assume_multiple %64, 8 : i32
      %66 = arith.index_cast %65 : i32 to index
      %c0_41 = arith.constant 0 : index
      %67 = vector.load %arg11[%66, %c0_41] : memref<8x128xf32, #tpu.memory_space<vmem>>, vector<8x128xf32>
      %68 = vector.broadcast %62 : vector<1x128xf32> to vector<8x128xf32>
      %69 = arith.subf %67, %68 : vector<8x128xf32>
      %70 = arith.mulf %69, %69 : vector<8x128xf32>
      %cst_42 = arith.constant dense<0.000000e+00> : vector<128xf32>
      %71 = vector.multi_reduction <add>, %70, %cst_42 [0] : vector<8x128xf32> to vector<128xf32>
      %72 = vector.shape_cast %71 : vector<128xf32> to vector<1x128xf32>
      %73 = arith.addf %63, %72 : vector<1x128xf32>
      %c1_i32_43 = arith.constant 1 : i32
      %cst_44 = arith.constant 1.250000e-01 : f32
      %74 = vector.broadcast %cst_44 : f32 to vector<1x128xf32>
      %75 = arith.mulf %73, %74 : vector<1x128xf32>
      %c0_45 = arith.constant 0 : index
      %c0_46 = arith.constant 0 : index
      %76 = vector.load %arg6[%c0_45, %c0_46] : memref<1x128xf32, #tpu.memory_space<vmem>>, vector<1x128xf32>
      %cst_47 = arith.constant 9.99999974E-6 : f32
      %77 = vector.broadcast %cst_47 : f32 to vector<1x128xf32>
      %78 = arith.addf %75, %77 : vector<1x128xf32>
      %79 = math.rsqrt %78 : vector<1x128xf32>
      %80 = arith.mulf %76, %79 : vector<1x128xf32>
      %c0_48 = arith.constant 0 : index
      %c0_49 = arith.constant 0 : index
      %81 = vector.load %arg7[%c0_48, %c0_49] : memref<1x128xf32, #tpu.memory_space<vmem>>, vector<1x128xf32>
      %82 = arith.mulf %62, %80 : vector<1x128xf32>
      %83 = arith.subf %81, %82 : vector<1x128xf32>
      %c0_50 = arith.constant 0 : index
      %c0_51 = arith.constant 0 : index
      %84 = vector.load %arg8[%c0_50, %c0_51] : memref<8x128xf32, #tpu.memory_space<vmem>>, vector<8x128xf32>
      %c0_52 = arith.constant 0 : index
      %c0_53 = arith.constant 0 : index
      %85 = vector.load %arg9[%c0_52, %c0_53] : memref<1x1xf32, #tpu.memory_space<vmem>>, vector<1x1xf32>
      %c0_i32_54 = arith.constant 0 : i32
      %c8_i32_55 = arith.constant 8 : i32
      %86 = arith.muli %c0_i32_54, %c8_i32_55 : i32
      %87 = tpu.assume_multiple %86, 8 : i32
      %88 = arith.index_cast %87 : i32 to index
      %c0_56 = arith.constant 0 : index
      %89 = vector.load %arg11[%88, %c0_56] : memref<8x128xf32, #tpu.memory_space<vmem>>, vector<8x128xf32>
      %90 = vector.broadcast %80 : vector<1x128xf32> to vector<8x128xf32>
      %91 = arith.mulf %89, %90 : vector<8x128xf32>
      %92 = vector.broadcast %83 : vector<1x128xf32> to vector<8x128xf32>
      %93 = arith.addf %91, %92 : vector<8x128xf32>
      %cst_57 = arith.constant 0.000000e+00 : f32
      %94 = vector.broadcast %cst_57 : f32 to vector<8x128xf32>
      %95 = arith.maximumf %93, %94 : vector<8x128xf32>
      %cst_58 = arith.constant dense<0.000000e+00> : vector<8x8xf32>
      %96 = tpu.matmul %84, %95, %cst_58 {dimension_numbers = #tpu.dot_dimension_numbers<[1], [1], [0], [0], [0, 0, 1, 0], [], []>} : vector<8x128xf32>, vector<8x128xf32>, vector<8x8xf32> -> vector<8x8xf32>
      %97 = vector.extract_strided_slice %96 {offsets = [0, 0], sizes = [1, 8], strides = [1, 1]} : vector<8x8xf32> to vector<1x8xf32>
      %98 = vector.broadcast %85 : vector<1x1xf32> to vector<1x8xf32>
      %99 = arith.addf %97, %98 : vector<1x8xf32>
      %100 = arith.index_cast %c0_i32_54 : i32 to index
      %c0_59 = arith.constant 0 : index
      %101 = vector.load %arg10[%100, %c0_59] : memref<1x8xf32, #tpu.memory_space<vmem>>, vector<1x8xf32>
      tpu.vector_store %arg10[%100, %c0_59], %99 {strides = array<i32>} : memref<1x8xf32, #tpu.memory_space<vmem>>, vector<1x8xf32>,
      %c1_i32_60 = arith.constant 1 : i32
    } else {
    }
    return
  }
  func.func @transform_0(%arg0: i32) -> (i32, i32) {
    %c0_i32 = arith.constant 0 : i32
    %c0_i32_0 = arith.constant 0 : i32
    return %arg0, %c0_i32 : i32, i32
  }
  func.func @transform_1(%arg0: i32) -> (i32, i32) {
    %c0_i32 = arith.constant 0 : i32
    %c0_i32_0 = arith.constant 0 : i32
    %c0_i32_1 = arith.constant 0 : i32
    return %c0_i32, %c0_i32_0 : i32, i32
  }
  func.func @transform_2(%arg0: i32) -> (i32, i32) {
    %c0_i32 = arith.constant 0 : i32
    %c0_i32_0 = arith.constant 0 : i32
    %c0_i32_1 = arith.constant 0 : i32
    return %c0_i32, %c0_i32_0 : i32, i32
  }
  func.func @transform_3(%arg0: i32) -> (i32, i32) {
    %c0_i32 = arith.constant 0 : i32
    %c0_i32_0 = arith.constant 0 : i32
    %c0_i32_1 = arith.constant 0 : i32
    return %c0_i32, %c0_i32_0 : i32, i32
  }
  func.func @transform_4(%arg0: i32) -> (i32, i32) {
    %c0_i32 = arith.constant 0 : i32
    %c0_i32_0 = arith.constant 0 : i32
    %c0_i32_1 = arith.constant 0 : i32
    return %c0_i32, %c0_i32_0 : i32, i32
  }
  func.func @transform_5(%arg0: i32) -> (i32, i32) {
    %c0_i32 = arith.constant 0 : i32
    %c0_i32_0 = arith.constant 0 : i32
    %c0_i32_1 = arith.constant 0 : i32
    return %c0_i32, %c0_i32_0 : i32, i32
  }
  func.func @transform_6(%arg0: i32) -> (i32, i32) {
    %c0_i32 = arith.constant 0 : i32
    %c0_i32_0 = arith.constant 0 : i32
    %c0_i32_1 = arith.constant 0 : i32
    return %c0_i32, %c0_i32_0 : i32, i32
  }
  func.func @transform_7(%arg0: i32) -> (i32, i32) {
    %c0_i32 = arith.constant 0 : i32
    %c0_i32_0 = arith.constant 0 : i32
    %c0_i32_1 = arith.constant 0 : i32
    return %c0_i32, %c0_i32_0 : i32, i32
  }
  func.func @transform_8(%arg0: i32) -> (i32, i32) {
    %c0_i32 = arith.constant 0 : i32
    %c0_i32_0 = arith.constant 0 : i32
    %c0_i32_1 = arith.constant 0 : i32
    return %c0_i32, %c0_i32_0 : i32, i32
  }
  func.func @transform_9(%arg0: i32) -> (i32, i32) {
    %c0_i32 = arith.constant 0 : i32
    %c0_i32_0 = arith.constant 0 : i32
    %c0_i32_1 = arith.constant 0 : i32
    return %c0_i32, %c0_i32_0 : i32, i32
  }
}

</mosaic_0001>

<bundles_post_ra>
// kernel: tpu_custom_call.1
= control target key start
LH: loop header
LB: loop body
LE: loop exit
PB: predicated region body
PF: predicated region fallthrough
CT: control target
= control target key end

     0   :  { %s2735_s0 = inlined_call_operand.hbm [shape: bf16[8,2200], index: 0, kind: input, shape index: {}]   ;;  %s2736_s1 = inlined_call_operand.hbm [shape: bf16[2200,128], index: 1, kind: input, shape index: {}]   ;;  %s2737_s2 = inlined_call_operand.vmem [shape: f32[1,128], index: 2, kind: input, shape index: {}]   ;;  %s2738_s3 = inlined_call_operand.vmem [shape: f32[1,128], index: 3, kind: input, shape index: {}]   ;;  %s2739_s4 = inlined_call_operand.hbm [shape: bf16[128,128], index: 4, kind: input, shape index: {}]   ;;  %s2740_s5 = inlined_call_operand.vmem [shape: f32[1,128], index: 5, kind: input, shape index: {}]   ;;  %s2741_s6 = inlined_call_operand.vmem [shape: f32[1,128], index: 6, kind: input, shape index: {}]   ;;  %s2742_s7 = inlined_call_operand.vmem [shape: f32[8,128], index: 7, kind: input, shape index: {}]   ;;  %s2743_s8 = inlined_call_operand.<no memory space> [shape: f32[1,1], index: 8, kind: input, shape index: {}]   ;;  %s2744_s9 = inlined_call_operand.hbm [shape: f32[1,8], index: 9, kind: output, shape index: {}]  }
   0x1   :  { %v14_v0 = vstv %s2743_s8 }
   0x2   :  { %15 = vst [vmem:[#allocation4] sm:$0x1] %v14_v0 }
   0x3   :  { %16 = vsyncpa [#allocation6], 0 }
   0x4   :  { %17 = vsyncpa [#allocation9], 0 }
   0x5   :  { %18 = vsyncpa [#allocation7], 0  ;;  %s2571_s11 = smov [#allocation8]   ;;  %s2477_s15 = scalar_lea.hbm %s2736_s1, 17600 }
   0x6   :  { %s34_s12 = sshll.u32 %s2571_s11, 4  ;;  %p2478_p0 = scmp.ne.s32.totalorder %s2736_s1, %s2477_s15  ;;  %s35_s12 = int_to_ptr.vmem [resolvable:$true] %s34_s12 }
   0x7   :  { %p2481_p1 = scmp.lt.u32.totalorder %s2477_s15, %s2736_s1 }
   0x9   :  { %p2483_p2 = pnand %p2481_p1, %p2478_p0 }
   0xb   :  { %2486 = shalt.err (!%p2483_p2)
}
   0xc   :  { %s2487_s8 = scalar_lea.vmem %s35_s12, 17600  ;;  %p2492_p4 = scmp.lt.s32.totalorder %s35_s12, %s35_s12 }
   0xd   :  { %p2488_p3 = scmp.ne.s32.totalorder %s35_s12, %s2487_s8  ;;  %p2493_p5 = scmp.lt.s32.totalorder %s2487_s8, %s2487_s8 }
   0xf   :  { %p2494_p6 = por %p2493_p5, %p2492_p4 }
  0x11   :  { %p2495_p7 = pnand %p2494_p6, %p2488_p3 }
  0x13   :  { %2498 = shalt.err (!%p2495_p7)
}
  0x14   :  { %s2572_s20 = smov 64   ;;  %s2573_s21 = smov 4  }
  0x15   :  { %40 = dma.hbm_to_vmem [thread:$0]  %s2736_s1, 17600, %s35_s12, [#allocation9], %s2572_s20, %s2572_s20, %s2573_s21  }
  0x16   :  { %s2574_s24 = smov [#allocation5]   ;;  %s2575_s26 = smov [#allocation10]  }
  0x17   :  { %s25_s25 = sshll.u32 %s2574_s24, 4  ;;  %s50_s27 = sshll.u32 %s2575_s26, 4  ;;  %s26_s25 = int_to_ptr.vmem [resolvable:$true] %s25_s25  ;;  %s51_s27 = int_to_ptr.vmem [resolvable:$true] %s50_s27 }
  0x18   :  { %s2499_s30 = scalar_lea.hbm %s2735_s0, 1152 }
  0x19   :  { %p2500_p8 = scmp.ne.s32.totalorder %s2735_s0, %s2499_s30  ;;  %p2503_p9 = scmp.lt.u32.totalorder %s2499_s30, %s2735_s0 }
  0x1b   :  { %p2505_p10 = pnand %p2503_p9, %p2500_p8 }
  0x1d   :  { %2508 = shalt.err (!%p2505_p10)
}
  0x1e   :  { %s2509_s1 = scalar_lea.vmem %s26_s25, 1152  ;;  %p2514_p12 = scmp.lt.s32.totalorder %s26_s25, %s26_s25 }
  0x1f   :  { %p2510_p11 = scmp.ne.s32.totalorder %s26_s25, %s2509_s1  ;;  %p2515_p13 = scmp.lt.s32.totalorder %s2509_s1, %s2509_s1 }
  0x21   :  { %p2516_p0 = por %p2515_p13, %p2514_p12 }
  0x23   :  { %p2517_p1 = pnand %p2516_p0, %p2510_p11 }
  0x25   :  { %2520 = shalt.err (!%p2517_p1)
}
  0x26   :  { %28 = dma.hbm_to_vmem [thread:$0]  %s2735_s0, 1152, %s26_s25, [#allocation6]  }
  0x27   :  { %s2521_s18 = scalar_lea.hbm %s2739_s4, 1024 }
  0x28   :  { %p2522_p2 = scmp.ne.s32.totalorder %s2739_s4, %s2521_s18  ;;  %p2525_p3 = scmp.lt.u32.totalorder %s2521_s18, %s2739_s4 }
  0x2a   :  { %p2527_p4 = pnand %p2525_p3, %p2522_p2 }
  0x2c   :  { %2530 = shalt.err (!%p2527_p4)
}
  0x2d   :  { %s2531_s24 = scalar_lea.vmem %s51_s27, 1024  ;;  %p2536_p6 = scmp.lt.s32.totalorder %s51_s27, %s51_s27 }
  0x2e   :  { %p2532_p5 = scmp.ne.s32.totalorder %s51_s27, %s2531_s24  ;;  %p2537_p7 = scmp.lt.s32.totalorder %s2531_s24, %s2531_s24 }
  0x30   :  { %p2538_p8 = por %p2537_p7, %p2536_p6 }
  0x32   :  { %p2539_p9 = pnand %p2538_p8, %p2532_p5 }
  0x34   :  { %2542 = shalt.err (!%p2539_p9)
}
  0x35   :  { %56 = dma.hbm_to_vmem [thread:$0]  %s2739_s4, 1024, %s51_s27, [#allocation9], %s2572_s20, %s2572_s20, %s2573_s21  }
  0x36   :  { %2565 = dma.done.wait [#allocation6], 1152  }
  0x37   :  { %2566 = vsyncadd [#allocation6], 4294966144 }
  0x38   :  { %2567 = dma.done.wait [#allocation9], 18624  }
  0x39   :  { %2568 = vsyncadd [#allocation9], 4294948672  ;;  %v2309_v1 = vld [vmem:[#allocation8 + $0x40] sm:$0xff]   ;;  %v2313_v5 = vld [vmem:[#allocation8 + $0x48] sm:$0xff]   ;;  %v2576_v7 = vmov 0   ;;  %vm1251_vm0 = vcmask 195584  }
  0x3a   :  { %v2310_v2 = vld [vmem:[#allocation8 + $0xc0] sm:$0xff]   ;;  %2087 = vmatprep.subr.bf16.mxu0 %v2309_v1  ;;  %v2314_v6 = vld [vmem:[#allocation8 + $0xc8] sm:$0xff]   ;;  %2308 = vset.pattern.permute.xlu0 %v2576_v7  ;;  %v2317_v10 = vld [vmem:[#allocation8 + $0x50] sm:$0xff]   ;;  %vm1255_vm1 = vcmask 1043456   ;;  %vm2578_vm2 = vmmov 0   ;;  %vm1904_vm3 = vcmask 57344  }
  0x3b   :  { %v2311_v3 = vld [vmem:[#allocation8] sm:$0xff]   ;;  %2109 = vmatprep.subr.bf16.mxu1 %v2310_v2  ;;  %v2315_v8 = vld [vmem:[#allocation8 + $0x8] sm:$0xff]   ;;  %v2318_v11 = vld [vmem:[#allocation8 + $0xd0] sm:$0xff]  }
  0x3c   :  { %v2312_v4 = vld [vmem:[#allocation8 + $0x80] sm:$0xff]   ;;  %2088 = vmatpush3.bf16.msra.mxu0 %v2311_v3  ;;  %v2316_v9 = vld [vmem:[#allocation8 + $0x88] sm:$0xff]   ;;  %v2319_v12 = vld [vmem:[#allocation8 + $0x10] sm:$0xff]  }
  0x3d   :  { %2110 = vmatpush3.bf16.msra.mxu1 %v2312_v4  ;;  %2089 = vmatprep.subr.bf16.mxu0 %v2313_v5  ;;  %v2320_v13 = vld [vmem:[#allocation8 + $0x90] sm:$0xff]   ;;  %v2321_v14 = vld [vmem:[#allocation8 + $0x58] sm:$0xff]   ;;  %v2325_v18 = vld [vmem:[#allocation8 + $0x60] sm:$0xff]  }
  0x3e   :  { %2111 = vmatprep.subr.bf16.mxu1 %v2314_v6  ;;  %v2322_v15 = vld [vmem:[#allocation8 + $0xd8] sm:$0xff]   ;;  %v2326_v19 = vld [vmem:[#allocation8 + $0xe0] sm:$0xff]   ;;  %v2329_v22 = vld [vmem:[#allocation8 + $0x68] sm:$0xff]  }
  0x3f   :  { %v2323_v16 = vld [vmem:[#allocation8 + $0x18] sm:$0xff]   ;;  %v2327_v20 = vld [vmem:[#allocation8 + $0x20] sm:$0xff]   ;;  %v2330_v23 = vld [vmem:[#allocation8 + $0xe8] sm:$0xff]  }
  0x40   :  { %2090 = vmatpush3.bf16.msra.mxu0 %v2315_v8  ;;  %v2324_v17 = vld [vmem:[#allocation8 + $0x98] sm:$0xff]   ;;  %v2328_v21 = vld [vmem:[#allocation8 + $0xa0] sm:$0xff]   ;;  %v2331_v24 = vld [vmem:[#allocation8 + $0x28] sm:$0xff]  }
  0x41   :  { %2112 = vmatpush3.bf16.msra.mxu1 %v2316_v9  ;;  %2091 = vmatprep.subr.bf16.mxu0 %v2317_v10  ;;  %v2332_v25 = vld [vmem:[#allocation8 + $0xa8] sm:$0xff]   ;;  %v2333_v26 = vld [vmem:[#allocation8 + $0x70] sm:$0xff]   ;;  %v2337_v30 = vld [vmem:[#allocation8 + $0x78] sm:$0xff]  }
  0x42   :  { %2113 = vmatprep.subr.bf16.mxu1 %v2318_v11  ;;  %v2334_v27 = vld [vmem:[#allocation8 + $0xf0] sm:$0xff]   ;;  %v2338_v31 = vld [vmem:[#allocation8 + $0xf8] sm:$0xff]   ;;  %v81_v35 = vld [vmem:[#allocation5 + $0x8] sm:$0xff] }
  0x43   :  { %v2335_v28 = vld [vmem:[#allocation8 + $0x30] sm:$0xff]   ;;  %v2339_v32 = vld [vmem:[#allocation8 + $0x38] sm:$0xff]   ;;  %v1924_v38 = vcombine.low %v81_v35, %v81_v35  ;;  %v1925_v39 = vcombine.high %v81_v35, %v81_v35  ;;  %v2345_v40 = vld [vmem:[#allocation8 + $0x140] sm:$0xff]  }
  0x44   :  { %2092 = vmatpush3.bf16.msra.mxu0 %v2319_v12  ;;  %v2336_v29 = vld [vmem:[#allocation8 + $0xb0] sm:$0xff]   ;;  %v2340_v33 = vld [vmem:[#allocation8 + $0xb8] sm:$0xff]   ;;  %v2346_v41 = vld [vmem:[#allocation8 + $0x100] sm:$0xff]  }
  0x45   :  { %2114 = vmatpush3.bf16.msra.mxu1 %v2320_v13  ;;  %2093 = vmatprep.subr.bf16.mxu0 %v2321_v14  ;;  %v80_v34 = vld [vmem:[#allocation5] sm:$0xff]  ;;  %v2347_v42 = vld [vmem:[#allocation8 + $0x1c0] sm:$0xff]   ;;  %v2349_v44 = vld [vmem:[#allocation8 + $0x148] sm:$0xff]  }
  0x46   :  { %2115 = vmatprep.subr.bf16.mxu1 %v2322_v15  ;;  %v1922_v36 = vcombine.low %v80_v34, %v80_v34  ;;  %v1923_v37 = vcombine.high %v80_v34, %v80_v34  ;;  %1331 = vmatprep.mubr.bf16.mxu1 %v1925_v39  ;;  %v2348_v43 = vld [vmem:[#allocation8 + $0x180] sm:$0xff]   ;;  %v2350_v45 = vld [vmem:[#allocation8 + $0x108] sm:$0xff]   ;;  %v2353_v48 = vld [vmem:[#allocation8 + $0x150] sm:$0xff]  }
  0x47   :  { %v2351_v46 = vld [vmem:[#allocation8 + $0x1c8] sm:$0xff]   ;;  %v2354_v49 = vld [vmem:[#allocation8 + $0x110] sm:$0xff]   ;;  %v2357_v52 = vld [vmem:[#allocation8 + $0x158] sm:$0xff]  }
  0x48   :  { %2094 = vmatpush3.bf16.msra.mxu0 %v2323_v16  ;;  %1291 = vmatprep.mubr.bf16.mxu0 %v1923_v37  ;;  %v2352_v47 = vld [vmem:[#allocation8 + $0x188] sm:$0xff]   ;;  %v2355_v50 = vld [vmem:[#allocation8 + $0x1d0] sm:$0xff]   ;;  %v2358_v53 = vld [vmem:[#allocation8 + $0x118] sm:$0xff]  }
  0x49   :  { %2116 = vmatpush3.bf16.msra.mxu1 %v2324_v17  ;;  %2095 = vmatprep.subr.bf16.mxu0 %v2325_v18  ;;  %v2356_v51 = vld [vmem:[#allocation8 + $0x190] sm:$0xff]   ;;  %v2359_v54 = vld [vmem:[#allocation8 + $0x1d8] sm:$0xff]   ;;  %v2361_v56 = vld [vmem:[#allocation8 + $0x160] sm:$0xff]  }
  0x4a   :  { %2117 = vmatprep.subr.bf16.mxu1 %v2326_v19  ;;  %v2360_v55 = vld [vmem:[#allocation8 + $0x198] sm:$0xff]   ;;  %v2362_v57 = vld [vmem:[#allocation8 + $0x120] sm:$0xff]   ;;  %v2365_v60 = vld [vmem:[#allocation8 + $0x168] sm:$0xff]  }
  0x4b   :  { %v2363_v58 = vld [vmem:[#allocation8 + $0x1e0] sm:$0xff]   ;;  %v2366_v61 = vld [vmem:[#allocation8 + $0x128] sm:$0xff]   ;;  %v2369_v0 = vld [vmem:[#allocation8 + $0x170] sm:$0xff]  }
  0x4c   :  { %2096 = vmatpush3.bf16.msra.mxu0 %v2327_v20  ;;  %v2364_v59 = vld [vmem:[#allocation8 + $0x1a0] sm:$0xff]   ;;  %v2367_v62 = vld [vmem:[#allocation8 + $0x1e8] sm:$0xff]   ;;  %v2370_v1 = vld [vmem:[#allocation8 + $0x130] sm:$0xff]  }
  0x4d   :  { %2118 = vmatpush3.bf16.msra.mxu1 %v2328_v21  ;;  %2097 = vmatprep.subr.bf16.mxu0 %v2329_v22  ;;  %v2368_v63 = vld [vmem:[#allocation8 + $0x1a8] sm:$0xff]   ;;  %v2371_v2 = vld [vmem:[#allocation8 + $0x1f0] sm:$0xff]   ;;  %v2373_v4 = vld [vmem:[#allocation8 + $0x178] sm:$0xff]  }
  0x4e   :  { %2119 = vmatprep.subr.bf16.mxu1 %v2330_v23  ;;  %v2372_v3 = vld [vmem:[#allocation8 + $0x1b0] sm:$0xff]   ;;  %v2374_v5 = vld [vmem:[#allocation8 + $0x138] sm:$0xff]   ;;  %v82_v8 = vld [vmem:[#allocation5 + $0x10] sm:$0xff] }
  0x4f   :  { %v2375_v6 = vld [vmem:[#allocation8 + $0x1f8] sm:$0xff]   ;;  %v1927_v9 = vcombine.high %v82_v8, %v82_v8  ;;  %v1926_v11 = vcombine.low %v82_v8, %v82_v8  ;;  %v2379_v12 = vld [vmem:[#allocation8 + $0x240] sm:$0xff]   ;;  %v83_v13 = vld [vmem:[#allocation5 + $0x18] sm:$0xff] }
  0x50   :  { %2098 = vmatpush3.bf16.msra.mxu0 %v2331_v24  ;;  %v2378_v10 = vld [vmem:[#allocation8 + $0x1b8] sm:$0xff]   ;;  %v1928_v14 = vcombine.low %v83_v13, %v83_v13  ;;  %v1929_v15 = vcombine.high %v83_v13, %v83_v13  ;;  %v2382_v16 = vld [vmem:[#allocation8 + $0x200] sm:$0xff]   ;;  %v2385_v19 = vld [vmem:[#allocation8 + $0x248] sm:$0xff]  }
  0x51   :  { %2120 = vmatpush3.bf16.msra.mxu1 %v2332_v25  ;;  %2099 = vmatprep.subr.bf16.mxu0 %v2333_v26  ;;  %v2383_v17 = vld [vmem:[#allocation8 + $0x2c0] sm:$0xff]   ;;  %v2386_v20 = vld [vmem:[#allocation8 + $0x208] sm:$0xff]   ;;  %v2389_v23 = vld [vmem:[#allocation8 + $0x250] sm:$0xff]  }
  0x52   :  { %2121 = vmatprep.subr.bf16.mxu1 %v2334_v27  ;;  %v2384_v18 = vld [vmem:[#allocation8 + $0x280] sm:$0xff]   ;;  %v2387_v21 = vld [vmem:[#allocation8 + $0x2c8] sm:$0xff]   ;;  %v2390_v24 = vld [vmem:[#allocation8 + $0x210] sm:$0xff]  }
  0x53   :  { %v2388_v22 = vld [vmem:[#allocation8 + $0x288] sm:$0xff]   ;;  %v2391_v25 = vld [vmem:[#allocation8 + $0x2d0] sm:$0xff]   ;;  %v2393_v27 = vld [vmem:[#allocation8 + $0x258] sm:$0xff]  }
  0x54   :  { %2100 = vmatpush3.bf16.msra.mxu0 %v2335_v28  ;;  %v2392_v26 = vld [vmem:[#allocation8 + $0x290] sm:$0xff]   ;;  %v2394_v28 = vld [vmem:[#allocation8 + $0x218] sm:$0xff]   ;;  %v2400_v34 = vld [vmem:[#allocation8 + $0x2a0] sm:$0xff]  }
  0x55   :  { %2122 = vmatpush3.bf16.msra.mxu1 %v2336_v29  ;;  %2101 = vmatprep.subr.bf16.mxu0 %v2337_v30  ;;  %v2395_v29 = vld [vmem:[#allocation8 + $0x2d8] sm:$0xff]   ;;  %v2401_v35 = vld [vmem:[#allocation8 + $0x268] sm:$0xff]   ;;  %v2405_v39 = vld [vmem:[#allocation8 + $0x270] sm:$0xff]  }
  0x56   :  { %2123 = vmatprep.subr.bf16.mxu1 %v2338_v31  ;;  %v2396_v30 = vld [vmem:[#allocation8 + $0x298] sm:$0xff]   ;;  %v2397_v31 = vld [vmem:[#allocation8 + $0x260] sm:$0xff]   ;;  %v2403_v37 = vld [vmem:[#allocation8 + $0x2e8] sm:$0xff]  }
  0x57   :  { %v2435_v8 = vld [vmem:[#allocation8 + $0x3e0] sm:$0xff]   ;;  %v2440_v13 = vld [vmem:[#allocation8 + $0x3a8] sm:$0xff]  }
  0x58   :  { %2102 = vmatpush3.bf16.msra.mxu0 %v2339_v32  ;;  %v2398_v32 = vld [vmem:[#allocation8 + $0x220] sm:$0xff]  }
  0x59   :  { %2124 = vmatpush3.bf16.msra.mxu1 %v2340_v33  ;;  %2131 = vmatprep.subr.bf16.mxu0 %v2345_v40  ;;  %v2399_v33 = vld [vmem:[#allocation8 + $0x2e0] sm:$0xff]   ;;  %v2406_v40 = vld [vmem:[#allocation8 + $0x230] sm:$0xff]  }
  0x5a   :  { %2153 = vmatprep.subr.bf16.mxu1 %v2347_v42  ;;  %v2408_v42 = vld [vmem:[#allocation8 + $0x2b0] sm:$0xff]  }
  0x5b   :  { %1292 = vmatmul.mubr.bf16.vlgmr.msra.gmra.mrb[0].mxu0 %v1922_v36  ;;  %v2402_v36 = vld [vmem:[#allocation8 + $0x228] sm:$0xff]  }
  0x5c   :  { %1332 = vmatmul.mubr.bf16.vlgmr.msra.gmra.mrb[0].mxu1 %v1924_v38  ;;  %2132 = vmatpush3.bf16.msra.mxu0 %v2346_v41  ;;  %v2404_v38 = vld [vmem:[#allocation8 + $0x2a8] sm:$0xff]   ;;  %v2407_v41 = vld [vmem:[#allocation8 + $0x2f0] sm:$0xff]  }
  0x5d   :  { %2154 = vmatpush3.bf16.msra.mxu1 %v2348_v43  ;;  %2133 = vmatprep.subr.bf16.mxu0 %v2349_v44  ;;  %v2409_v43 = vld [vmem:[#allocation8 + $0x278] sm:$0xff]  }
  0x5e   :  { %2155 = vmatprep.subr.bf16.mxu1 %v2351_v46  ;;  %1371 = vmatprep.mubr.bf16.mxu0 %v1927_v9  ;;  %v2410_v44 = vld [vmem:[#allocation8 + $0x238] sm:$0xff]   ;;  %v2436_v9 = vld [vmem:[#allocation8 + $0x3a0] sm:$0xff]  }
  0x5f   :  { %1411 = vmatprep.mubr.bf16.mxu1 %v1929_v15  ;;  %v84_v46 = vld [vmem:[#allocation5 + $0x20] sm:$0xff]  ;;  %v2442_v15 = vld [vmem:[#allocation8 + $0x330] sm:$0xff]  }
  0x60   :  { %2134 = vmatpush3.bf16.msra.mxu0 %v2350_v45  ;;  %v2411_v45 = vld [vmem:[#allocation8 + $0x2f8] sm:$0xff]  }
  0x61   :  { %2156 = vmatpush3.bf16.msra.mxu1 %v2352_v47  ;;  %2135 = vmatprep.subr.bf16.mxu0 %v2353_v48  ;;  %v1930_v47 = vcombine.low %v84_v46, %v84_v46  ;;  %v1931_v48 = vcombine.high %v84_v46, %v84_v46 }
  0x62   :  { %2157 = vmatprep.subr.bf16.mxu1 %v2355_v50  ;;  %v2415_v50 = vld [vmem:[#allocation8 + $0x340] sm:$0xff]  }
  0x64   :  { %2136 = vmatpush3.bf16.msra.mxu0 %v2354_v49  ;;  %v2414_v49 = vld [vmem:[#allocation8 + $0x2b8] sm:$0xff]  }
  0x65   :  { %2158 = vmatpush3.bf16.msra.mxu1 %v2356_v51  ;;  %2137 = vmatprep.subr.bf16.mxu0 %v2357_v52  ;;  %v85_v51 = vld [vmem:[#allocation5 + $0x28] sm:$0xff] }
  0x66   :  { %2159 = vmatprep.subr.bf16.mxu1 %v2359_v54  ;;  %v1932_v52 = vcombine.low %v85_v51, %v85_v51  ;;  %v2418_v54 = vld [vmem:[#allocation8 + $0x300] sm:$0xff]  }
  0x68   :  { %2138 = vmatpush3.bf16.msra.mxu0 %v2358_v53  ;;  %v1933_v53 = vcombine.high %v85_v51, %v85_v51 }
  0x69   :  { %2160 = vmatpush3.bf16.msra.mxu1 %v2360_v55  ;;  %2139 = vmatprep.subr.bf16.mxu0 %v2361_v56  ;;  %v2419_v55 = vld [vmem:[#allocation8 + $0x3c0] sm:$0xff]  }
  0x6a   :  { %2161 = vmatprep.subr.bf16.mxu1 %v2363_v58  ;;  %v2420_v56 = vld [vmem:[#allocation8 + $0x380] sm:$0xff]   ;;  %v2422_v58 = vld [vmem:[#allocation8 + $0x308] sm:$0xff]  }
  0x6c   :  { %2140 = vmatpush3.bf16.msra.mxu0 %v2362_v57  ;;  %v2421_v57 = vld [vmem:[#allocation8 + $0x348] sm:$0xff]  }
  0x6d   :  { %2162 = vmatpush3.bf16.msra.mxu1 %v2364_v59  ;;  %2141 = vmatprep.subr.bf16.mxu0 %v2365_v60  ;;  %v2423_v59 = vld [vmem:[#allocation8 + $0x3c8] sm:$0xff]  }
  0x6e   :  { %2163 = vmatprep.subr.bf16.mxu1 %v2367_v62  ;;  %v2424_v60 = vld [vmem:[#allocation8 + $0x388] sm:$0xff]   ;;  %v2426_v62 = vld [vmem:[#allocation8 + $0x310] sm:$0xff]  }
  0x70   :  { %2142 = vmatpush3.bf16.msra.mxu0 %v2366_v61  ;;  %v2425_v61 = vld [vmem:[#allocation8 + $0x350] sm:$0xff]  }
  0x71   :  { %2164 = vmatpush3.bf16.msra.mxu1 %v2368_v63  ;;  %2143 = vmatprep.subr.bf16.mxu0 %v2369_v0  ;;  %v2427_v63 = vld [vmem:[#allocation8 + $0x3d0] sm:$0xff]  }
  0x72   :  { %2165 = vmatprep.subr.bf16.mxu1 %v2371_v2  ;;  %v2428_v0 = vld [vmem:[#allocation8 + $0x390] sm:$0xff]   ;;  %v2430_v2 = vld [vmem:[#allocation8 + $0x318] sm:$0xff]  }
  0x74   :  { %2144 = vmatpush3.bf16.msra.mxu0 %v2370_v1  ;;  %v2429_v1 = vld [vmem:[#allocation8 + $0x358] sm:$0xff]  }
  0x75   :  { %2166 = vmatpush3.bf16.msra.mxu1 %v2372_v3  ;;  %2145 = vmatprep.subr.bf16.mxu0 %v2373_v4  ;;  %v2431_v3 = vld [vmem:[#allocation8 + $0x3d8] sm:$0xff]  }
  0x76   :  { %2167 = vmatprep.subr.bf16.mxu1 %v2375_v6  ;;  %v2432_v4 = vld [vmem:[#allocation8 + $0x398] sm:$0xff]   ;;  %v2434_v6 = vld [vmem:[#allocation8 + $0x320] sm:$0xff]  }
  0x78   :  { %2146 = vmatpush3.bf16.msra.mxu0 %v2374_v5  ;;  %v2433_v5 = vld [vmem:[#allocation8 + $0x360] sm:$0xff]  }
  0x79   :  { %2168 = vmatpush3.bf16.msra.mxu1 %v2378_v10  ;;  %2175 = vmatprep.subr.bf16.mxu0 %v2379_v12  ;;  %v2437_v10 = vld [vmem:[#allocation8 + $0x368] sm:$0xff]  }
  0x7a   :  { %2197 = vmatprep.subr.bf16.mxu1 %v2383_v17  ;;  %v2439_v12 = vld [vmem:[#allocation8 + $0x3e8] sm:$0xff]   ;;  %v2444_v17 = vld [vmem:[#allocation8 + $0x3b0] sm:$0xff]  }
  0x7b   :  { %1372 = vmatmul.mubr.bf16.vlgmr.msra.gmra.mrb[4].mxu0 %v1926_v11  ;;  %v2438_v11 = vld [vmem:[#allocation8 + $0x328] sm:$0xff]  }
  0x7c   :  { %2176 = vmatpush3.bf16.msra.mxu0 %v2382_v16  ;;  %1412 = vmatmul.mubr.bf16.vlgmr.msra.gmra.mrb[4].mxu1 %v1928_v14  ;;  %v2441_v14 = vld [vmem:[#allocation8 + $0x370] sm:$0xff]  }
  0x7d   :  { %2198 = vmatpush3.bf16.msra.mxu1 %v2384_v18  ;;  %2177 = vmatprep.subr.bf16.mxu0 %v2385_v19  ;;  %v2443_v16 = vld [vmem:[#allocation8 + $0x3f0] sm:$0xff]   ;;  %v2445_v18 = vld [vmem:[#allocation8 + $0x378] sm:$0xff]  }
  0x7e   :  { %2199 = vmatprep.subr.bf16.mxu1 %v2387_v21  ;;  %1451 = vmatprep.mubr.bf16.mxu0 %v1931_v48  ;;  %v2446_v19 = vld [vmem:[#allocation8 + $0x338] sm:$0xff]   ;;  %v86_v21 = vld [vmem:[#allocation5 + $0x30] sm:$0xff] }
  0x7f   :  { %1491 = vmatprep.mubr.bf16.mxu1 %v1933_v53 }
  0x80   :  { %2178 = vmatpush3.bf16.msra.mxu0 %v2386_v20  ;;  %v2447_v20 = vld [vmem:[#allocation8 + $0x3f8] sm:$0xff]  }
  0x81   :  { %2200 = vmatpush3.bf16.msra.mxu1 %v2388_v22  ;;  %2179 = vmatprep.subr.bf16.mxu0 %v2389_v23  ;;  %v1934_v22 = vcombine.low %v86_v21, %v86_v21  ;;  %v1935_v23 = vcombine.high %v86_v21, %v86_v21  ;;  %v2472_v21 = vld [vmem:[#allocation10 + $0x38] sm:$0xff]  }
  0x82   :  { %2201 = vmatprep.subr.bf16.mxu1 %v2391_v25  ;;  %v87_v25 = vld [vmem:[#allocation5 + $0x38] sm:$0xff] }
  0x84   :  { %2180 = vmatpush3.bf16.msra.mxu0 %v2390_v24  ;;  %v2450_v24 = vld [vmem:[#allocation8 + $0x3b8] sm:$0xff]  }
  0x85   :  { %2202 = vmatpush3.bf16.msra.mxu1 %v2392_v26  ;;  %2181 = vmatprep.subr.bf16.mxu0 %v2393_v27  ;;  %v1936_v26 = vcombine.low %v87_v25, %v87_v25  ;;  %v1937_v27 = vcombine.high %v87_v25, %v87_v25 }
  0x86   :  { %2203 = vmatprep.subr.bf16.mxu1 %v2395_v29  ;;  %v2454_v29 = vld [vmem:[#allocation8 + $0x408] sm:$0xff]  }
  0x88   :  { %2182 = vmatpush3.bf16.msra.mxu0 %v2394_v28  ;;  %v2453_v28 = vld [vmem:[#allocation8 + $0x400] sm:$0xff]  }
  0x89   :  { %2204 = vmatpush3.bf16.msra.mxu1 %v2396_v30  ;;  %2183 = vmatprep.subr.bf16.mxu0 %v2397_v31  ;;  %v2455_v30 = vld [vmem:[#allocation8 + $0x410] sm:$0xff]   ;;  %v88_v31 = vld [vmem:[#allocation5 + $0x40] sm:$0xff] }
  0x8a   :  { %2205 = vmatprep.subr.bf16.mxu1 %v2399_v33  ;;  %v2456_v33 = vld [vmem:[#allocation8 + $0x418] sm:$0xff]  }
  0x8c   :  { %2184 = vmatpush3.bf16.msra.mxu0 %v2398_v32  ;;  %v1939_v32 = vcombine.high %v88_v31, %v88_v31 }
  0x8d   :  { %2206 = vmatpush3.bf16.msra.mxu1 %v2400_v34  ;;  %2185 = vmatprep.subr.bf16.mxu0 %v2401_v35  ;;  %v2457_v34 = vld [vmem:[#allocation8 + $0x420] sm:$0xff]   ;;  %v2458_v35 = vld [vmem:[#allocation8 + $0x428] sm:$0xff]  }
  0x8e   :  { %2207 = vmatprep.subr.bf16.mxu1 %v2403_v37  ;;  %v2460_v37 = vld [vmem:[#allocation8 + $0x438] sm:$0xff]  }
  0x90   :  { %2186 = vmatpush3.bf16.msra.mxu0 %v2402_v36  ;;  %v2459_v36 = vld [vmem:[#allocation8 + $0x430] sm:$0xff]  }
  0x91   :  { %2208 = vmatpush3.bf16.msra.mxu1 %v2404_v38  ;;  %2187 = vmatprep.subr.bf16.mxu0 %v2405_v39  ;;  %v2461_v38 = vld [vmem:[#allocation8 + $0x440] sm:$0xff]   ;;  %v2462_v39 = vld [vmem:[#allocation8 + $0x448] ss:$0 sps:$4 sm:$0xff]  }
  0x92   :  { %2209 = vmatprep.subr.bf16.mxu1 %v2407_v41  ;;  %v1938_v41 = vcombine.low %v88_v31, %v88_v31 }
  0x94   :  { %2188 = vmatpush3.bf16.msra.mxu0 %v2406_v40  ;;  %v1257_v40 = vsel %vm1255_vm1, %v2462_v39, 0 }
  0x95   :  { %2210 = vmatpush3.bf16.msra.mxu1 %v2408_v42  ;;  %2189 = vmatprep.subr.bf16.mxu0 %v2409_v43  ;;  %v2577_v42 = vmov 0.0  }
  0x96   :  { %2211 = vmatprep.subr.bf16.mxu1 %v2411_v45  ;;  %79 = vst [vmem:[#allocation3] sm:$0x1] %v2577_v42 }
  0x98   :  { %2190 = vmatpush3.bf16.msra.mxu0 %v2410_v44 }
  0x99   :  { %2212 = vmatpush3.bf16.msra.mxu1 %v2414_v49  ;;  %2219 = vmatprep.subr.bf16.mxu0 %v2415_v50 }
  0x9a   :  { %2241 = vmatprep.subr.bf16.mxu1 %v2419_v55 }
  0x9b   :  { %1452 = vmatmul.mubr.bf16.vlgmr.msra.gmra.mrb[8].mxu0 %v1930_v47 }
  0x9c   :  { %2220 = vmatpush3.bf16.msra.mxu0 %v2418_v54  ;;  %1492 = vmatmul.mubr.bf16.vlgmr.msra.gmra.mrb[8].mxu1 %v1932_v52 }
  0x9d   :  { %2242 = vmatpush3.bf16.msra.mxu1 %v2420_v56  ;;  %2221 = vmatprep.subr.bf16.mxu0 %v2421_v57 }
  0x9e   :  { %2243 = vmatprep.subr.bf16.mxu1 %v2423_v59  ;;  %1531 = vmatprep.mubr.bf16.mxu0 %v1935_v23 }
  0x9f   :  { %1571 = vmatprep.mubr.bf16.mxu1 %v1937_v27 }
  0xa0   :  { %2222 = vmatpush3.bf16.msra.mxu0 %v2422_v58 }
  0xa1   :  { %2244 = vmatpush3.bf16.msra.mxu1 %v2424_v60  ;;  %2223 = vmatprep.subr.bf16.mxu0 %v2425_v61 }
  0xa2   :  { %2245 = vmatprep.subr.bf16.mxu1 %v2427_v63 }
  0xa4   :  { %2224 = vmatpush3.bf16.msra.mxu0 %v2426_v62 }
  0xa5   :  { %2246 = vmatpush3.bf16.msra.mxu1 %v2428_v0  ;;  %2225 = vmatprep.subr.bf16.mxu0 %v2429_v1  ;;  %v2465_v1 = vld [vmem:[#allocation10] sm:$0xff]  }
  0xa6   :  { %2247 = vmatprep.subr.bf16.mxu1 %v2431_v3  ;;  %v2467_v3 = vld [vmem:[#allocation10 + $0x10] sm:$0xff]  }
  0xa8   :  { %2226 = vmatpush3.bf16.msra.mxu0 %v2430_v2  ;;  %v2466_v2 = vld [vmem:[#allocation10 + $0x8] sm:$0xff]  }
  0xa9   :  { %2248 = vmatpush3.bf16.msra.mxu1 %v2432_v4  ;;  %2227 = vmatprep.subr.bf16.mxu0 %v2433_v5  ;;  %v2468_v4 = vld [vmem:[#allocation10 + $0x18] sm:$0xff]  }
  0xaa   :  { %2249 = vmatprep.subr.bf16.mxu1 %v2435_v8  ;;  %v2469_v8 = vld [vmem:[#allocation10 + $0x20] sm:$0xff]  }
  0xac   :  { %2228 = vmatpush3.bf16.msra.mxu0 %v2434_v6 }
  0xad   :  { %2250 = vmatpush3.bf16.msra.mxu1 %v2436_v9  ;;  %2229 = vmatprep.subr.bf16.mxu0 %v2437_v10 }
  0xae   :  { %2251 = vmatprep.subr.bf16.mxu1 %v2439_v12 }
  0xb0   :  { %2230 = vmatpush3.bf16.msra.mxu0 %v2438_v11 }
  0xb1   :  { %2252 = vmatpush3.bf16.msra.mxu1 %v2440_v13  ;;  %2231 = vmatprep.subr.bf16.mxu0 %v2441_v14 }
  0xb2   :  { %2253 = vmatprep.subr.bf16.mxu1 %v2443_v16 }
  0xb4   :  { %2232 = vmatpush3.bf16.msra.mxu0 %v2442_v15 }
  0xb5   :  { %2254 = vmatpush3.bf16.msra.mxu1 %v2444_v17  ;;  %2233 = vmatprep.subr.bf16.mxu0 %v2445_v18  ;;  %v2470_v18 = vld [vmem:[#allocation10 + $0x28] sm:$0xff]  }
  0xb6   :  { %2255 = vmatprep.subr.bf16.mxu1 %v2447_v20  ;;  %v2471_v20 = vld [vmem:[#allocation10 + $0x30] sm:$0xff]  }
  0xb8   :  { %2234 = vmatpush3.bf16.msra.mxu0 %v2446_v19 }
  0xb9   :  { %1579 = vmatprep.subr.bf16.mxu0 %v2576_v7  ;;  %2256 = vmatpush3.bf16.msra.mxu1 %v2450_v24 }
  0xba   :  { %2274 = vmatprep.subr.bf16.mxu1 %v2577_v42 }
  0xbb   :  { %1532 = vmatmul.mubr.bf16.vlgmr.msra.gmra.mrb[12].mxu0 %v1934_v22 }
  0xbc   :  { %1580 = vmatpush1.bf16.msra.mxu0 %v2453_v28  ;;  %1572 = vmatmul.mubr.bf16.vlgmr.msra.gmra.mrb[12].mxu1 %v1936_v26 }
  0xbd   :  { %1581 = vmatprep.subr.bf16.mxu0 %v2576_v7  ;;  %2078 = vmatprep.mubr.msk.bf16.mxu0 %vm1251_vm0, %v1939_v32 }
  0xbe   :  { %2275 = vmatpush3.bf16.msra.mxu1 %v2465_v1  ;;  %2290 = vmatprep.mubr.msk.bf16.mxu1 %vm2578_vm2, %v2577_v42 }
  0xbf   :  { %2276 = vmatprep.subr.bf16.mxu1 %v2577_v42 }
  0xc0   :  { %1582 = vmatpush1.bf16.msra.mxu0 %v2454_v29 }
  0xc1   :  { %1583 = vmatprep.subr.bf16.mxu0 %v2576_v7 }
  0xc2   :  { %2277 = vmatpush3.bf16.msra.mxu1 %v2466_v2  ;;  %v1657_v2 = vld [vmem:[%s2738_s3] sm:$0x1] }
  0xc3   :  { %2278 = vmatprep.subr.bf16.mxu1 %v2577_v42 }
  0xc4   :  { %1584 = vmatpush1.bf16.msra.mxu0 %v2455_v30 }
  0xc5   :  { %1585 = vmatprep.subr.bf16.mxu0 %v2576_v7 }
  0xc6   :  { %2279 = vmatpush3.bf16.msra.mxu1 %v2467_v3 }
  0xc7   :  { %2280 = vmatprep.subr.bf16.mxu1 %v2577_v42 }
  0xc8   :  { %1586 = vmatpush1.bf16.msra.mxu0 %v2456_v33 }
  0xc9   :  { %1587 = vmatprep.subr.bf16.mxu0 %v2576_v7 }
  0xca   :  { %2281 = vmatpush3.bf16.msra.mxu1 %v2468_v4 }
  0xcb   :  { %2282 = vmatprep.subr.bf16.mxu1 %v2577_v42 }
  0xcc   :  { %1588 = vmatpush1.bf16.msra.mxu0 %v2457_v34 }
  0xcd   :  { %1589 = vmatprep.subr.bf16.mxu0 %v2576_v7 }
  0xce   :  { %2283 = vmatpush3.bf16.msra.mxu1 %v2469_v8 }
  0xcf   :  { %2284 = vmatprep.subr.bf16.mxu1 %v2577_v42 }
  0xd0   :  { %1590 = vmatpush1.bf16.msra.mxu0 %v2458_v35 }
  0xd1   :  { %1591 = vmatprep.subr.bf16.mxu0 %v2576_v7 }
  0xd2   :  { %2285 = vmatpush3.bf16.msra.mxu1 %v2470_v18 }
  0xd3   :  { %2286 = vmatprep.subr.bf16.mxu1 %v2577_v42 }
  0xd4   :  { %1592 = vmatpush1.bf16.msra.mxu0 %v2459_v36 }
  0xd5   :  { %1593 = vmatprep.subr.bf16.mxu0 %v2576_v7 }
  0xd6   :  { %2287 = vmatpush3.bf16.msra.mxu1 %v2471_v20 }
  0xd7   :  { %2288 = vmatprep.subr.bf16.mxu1 %v2577_v42 }
  0xd8   :  { %1594 = vmatpush1.bf16.msra.mxu0 %v2460_v37 }
  0xd9   :  { %1595 = vmatprep.subr.bf16.mxu0 %v2576_v7 }
  0xda   :  { %2289 = vmatpush3.bf16.msra.mxu1 %v2472_v21 }
  0xdb   :  { %2294 = vmatprep.subr.mxu1 %v2577_v42 }
  0xdc   :  { %1596 = vmatpush1.bf16.msra.mxu0 %v2461_v38 }
  0xdd   :  { %1597 = vmatprep.subr.bf16.mxu0 %v2576_v7 }
  0xe0   :  { %1598 = vmatpush1.bf16.msra.mxu0 %v1257_v40 }
  0xe3   :  { %1612 = vmatmul.mubr.bf16.vlgmr.msra.gmra.mrb[16].mxu0 %v1938_v41 }
 0x12e   :  { %v2103_v43 = vpop.f32.mrb[0].mxu0 }
 0x12f   :  { %v2125_v44 = vpop.f32.mrb[0].mxu1  ;;  %v2104_v45 = vpop.f32.mrb[1].mxu0 }
 0x130   :  { %v2126_v46 = vpop.f32.mrb[1].mxu1  ;;  %v2105_v47 = vadd.f32 %v2104_v45, %v2103_v43  ;;  %v2106_v49 = vpop.f32.mrb[2].mxu0  ;;  %v1622_v45 = vld [vmem:[#allocation3] sm:$0x1] }
 0x131   :  { %v2127_v48 = vadd.f32 %v2126_v46, %v2125_v44  ;;  %v2128_v50 = vpop.f32.mrb[2].mxu1  ;;  %v2107_v51 = vpop.f32.mrb[3].mxu0 }
 0x132   :  { %v2129_v52 = vpop.f32.mrb[3].mxu1 }
 0x133   :  { %v1334_v7 = vadd.f32 %v2127_v48, %v2105_v47  ;;  %v1638_v48 = vlaneseq }
 0x135   :  { %v1639_v49 = vshrl.u32 %v1638_v48, 7 }
 0x137   :  { %v2698_v50 = vsub.s32 0, %v1639_v49 }
 0x14e   :  { %v2147_v53 = vpop.f32.mrb[4].mxu0 }
 0x14f   :  { %v2148_v54 = vpop.f32.mrb[5].mxu0  ;;  %v2169_v55 = vpop.f32.mrb[4].mxu1 }
 0x150   :  { %v2149_v56 = vadd.f32 %v2148_v54, %v2147_v53  ;;  %v2150_v57 = vpop.f32.mrb[6].mxu0  ;;  %v2170_v58 = vpop.f32.mrb[5].mxu1 }
 0x151   :  { %v2151_v59 = vpop.f32.mrb[7].mxu0  ;;  %v2171_v60 = vadd.f32 %v2170_v58, %v2169_v55  ;;  %v2172_v61 = vpop.f32.mrb[6].mxu1 }
 0x152   :  { %v1374_v62 = vadd.f32 %v2149_v56, %v1334_v7  ;;  %v2173_v63 = vpop.f32.mrb[7].mxu1 }
 0x153   :  { %v1653_v63 = vld [vmem:[%s2737_s2] sm:$0x1] }
 0x154   :  { %v1414_v0 = vadd.f32 %v2171_v60, %v1374_v62 }
 0x16e   :  { %v2191_v5 = vpop.f32.mrb[8].mxu0 }
 0x16f   :  { %v2192_v6 = vpop.f32.mrb[9].mxu0  ;;  %v2213_v11 = vpop.f32.mrb[8].mxu1 }
 0x170   :  { %v2193_v9 = vadd.f32 %v2192_v6, %v2191_v5  ;;  %v2194_v10 = vpop.f32.mrb[10].mxu0  ;;  %v2214_v13 = vpop.f32.mrb[9].mxu1 }
 0x171   :  { %v2195_v12 = vpop.f32.mrb[11].mxu0  ;;  %v2215_v15 = vadd.f32 %v2214_v13, %v2213_v11  ;;  %v2216_v16 = vpop.f32.mrb[10].mxu1 }
 0x172   :  { %v1454_v14 = vadd.f32 %v2193_v9, %v1414_v0  ;;  %v2217_v17 = vpop.f32.mrb[11].mxu1  ;;  %v1808_v12 = vld [vmem:[#allocation4] sm:$0x1] }
 0x173   :  { %1896 = vperm.xlu0 %2308, %v1808_v12  }
 0x174   :  { %v1494_v19 = vadd.f32 %v2215_v15, %v1454_v14 }
 0x18e   :  { %v2235_v22 = vpop.f32.mrb[12].mxu0 }
 0x18f   :  { %v2236_v23 = vpop.f32.mrb[13].mxu0  ;;  %v2257_v26 = vpop.f32.mrb[12].mxu1 }
 0x190   :  { %v2237_v24 = vadd.f32 %v2236_v23, %v2235_v22  ;;  %v2238_v25 = vpop.f32.mrb[14].mxu0  ;;  %v2258_v28 = vpop.f32.mrb[13].mxu1 }
 0x191   :  { %v2239_v27 = vpop.f32.mrb[15].mxu0  ;;  %v2259_v30 = vadd.f32 %v2258_v28, %v2257_v26  ;;  %v2260_v31 = vpop.f32.mrb[14].mxu1 }
 0x192   :  { %v1534_v29 = vadd.f32 %v2237_v24, %v1494_v19  ;;  %v2261_v32 = vpop.f32.mrb[15].mxu1 }
 0x194   :  { %v1574_v33 = vadd.f32 %v2259_v30, %v1534_v29 }
 0x1b6   :  { %v1613_v34 = vpop.f32.mrb[16].mxu0 }
 0x1b7   :  { %v1614_v35 = vadd.f32 %v1613_v34, %v1574_v33  ;;  %v1615_v36 = vpop.f32.mrb[17].mxu0  ;;  %v1800_v33 = vld [vmem:[%s2740_s5] sm:$0x1]  ;;  %s2579_s5 = smov [#allocation11]  }
 0x1b8   :  { %v1616_v37 = vpop.f32.mrb[18].mxu0  ;;  %v1804_v36 = vld [vmem:[%s2741_s6] sm:$0x1]  ;;  %s1912_s6 = sshll.u32 %s2579_s5, 4  ;;  %s1913_s6 = int_to_ptr.vmem [resolvable:$true] %s1912_s6 }
 0x1b9   :  { %v1623_v38 = vrot.slane %v1614_v35, 4  ;;  %v1617_v39 = vpop.f32.mrb[19].mxu0  ;;  %s2543_s10 = scalar_lea.vmem %s1913_s6, 16  ;;  %s2547_s11 = scalar_lea.vmem %s1913_s6, 32 }
 0x1ba   :  { %p2544_p10 = scmp.ne.s32.totalorder %s1913_s6, %s2543_s10  ;;  %p2548_p11 = scmp.lt.s32.totalorder %s1913_s6, %s1913_s6 }
 0x1bb   :  { %v1624_v40 = vadd.f32 %v1623_v38, %v1614_v35  ;;  %p2549_p12 = scmp.lt.s32.totalorder %s2547_s11, %s2543_s10 }
 0x1bd   :  { %v1625_v41 = vrot.slane %v1624_v40, 2  ;;  %p2550_p13 = por %p2549_p12, %p2548_p11 }
 0x1bf   :  { %v1626_v43 = vadd.f32 %v1625_v41, %v1624_v40  ;;  %p2551_p0 = pnand %p2550_p13, %p2544_p10 }
 0x1c1   :  { %v1627_v44 = vrot.slane %v1626_v43, 1 }
 0x1c3   :  { %v1628_v46 = vadd.f32 %v1627_v44, %v1626_v43 }
 0x1c5   :  { %v1629_v47 = vadd.f32 %v1628_v46, %v1622_v45  ;;  %v1807_v45 = vld [vmem:[%s2742_s7] sm:$0xff] }
 0x1c7   :  { %1630 = vst [vmem:[#allocation3] sm:$0x1] %v1629_v47 }
 0x1ce   :  { %v1634_v51 = vld [vmem:[#allocation3] sm:$0x1] }
 0x1cf   :  { %v1635_v52 = vmul.f32 0.125, %v1634_v51 }
 0x1d1   :  { %v1641_v7 = vrot.slane %v1635_v52, %v2698_v50 }
 0x1d3   :  { %v1643_v53 = vsub.f32 %v1614_v35, %v1641_v7 }
 0x1d5   :  { %v1644_v54 = vmul.f32 %v1643_v53, %v1643_v53 }
 0x1d7   :  { %v1645_v55 = vrot.slane %v1644_v54, 4 }
 0x1d9   :  { %v1646_v56 = vadd.f32 %v1645_v55, %v1644_v54 }
 0x1db   :  { %v1647_v57 = vrot.slane %v1646_v56, 2 }
 0x1dd   :  { %v1648_v58 = vadd.f32 %v1647_v57, %v1646_v56 }
 0x1df   :  { %v1649_v59 = vrot.slane %v1648_v58, 1 }
 0x1e1   :  { %v1650_v60 = vadd.f32 %v1649_v59, %v1648_v58 }
 0x1e3   :  { %v1652_v61 = vmul.f32 0.125, %v1650_v60 }
 0x1e5   :  { %v1654_v62 = vadd.f32 1e-05, %v1652_v61 }
 0x1e7   :  { %2473 = vrsqrt.f32 %v1654_v62 }
 0x1f1   :  { %v2474_v0 = vpop.eup %2473 }
 0x1f2   :  { %v1656_v1 = vmul.f32 %v2474_v0, %v1653_v63  ;;  %v1897_v46 = vpop.permute.xlu0 %1896 }
 0x1f3   :  { %v1902_v47 = vrot.slane %v1897_v46, %v2698_v50 }
 0x1f4   :  { %v1680_v3 = vrot.slane %v1656_v1, %v2698_v50  ;;  %v1658_v4 = vmul.f32 %v1656_v1, %v1635_v52 }
 0x1f6   :  { %v1659_v5 = vsub.f32 %v1657_v2, %v1658_v4  ;;  %v1682_v6 = vmul.f32 %v1680_v3, %v1614_v35 }
 0x1f8   :  { %v1687_v8 = vrot.slane %v1659_v5, %v2698_v50 }
 0x1fa   :  { %v1689_v9 = vadd.f32 %v1687_v8, %v1682_v6 }
 0x1fc   :  { %v1690_v10 = vmax.f32 %v1689_v9, 0.0 }
 0x1fe   :  { %v1691_v11 = vpack.c.bf16 %v1690_v10, %v1690_v10 }
 0x200   :  { %2291 = vmatmul.mubr.bf16.vlgmr.msra.gmra.mrb[16].mxu1 %v1691_v11 }
 0x201   :  { %2296 = vmatprep.mubr.msk.f32.mxu1 %vm2578_vm2, %v2577_v42 }
 0x2d3   :  { %v1774_v13 = vpop.f32.mrb[16].mxu1 }
 0x2d4   :  { %v1781_v14 = vrot.slane %v1774_v13, 4  ;;  %v2292_v15 = vpop.f32.mrb[17].mxu1 }
 0x2d5   :  { %v1777_v16 = vpop.f32.mrb[18].mxu1 }
 0x2d6   :  { %v1782_v17 = vadd.f32 %v1781_v14, %v1774_v13  ;;  %v2293_v18 = vpop.f32.mrb[19].mxu1 }
 0x2d8   :  { %v1783_v19 = vrot.slane %v1782_v17, 2 }
 0x2da   :  { %v1784_v20 = vadd.f32 %v1783_v19, %v1782_v17 }
 0x2dc   :  { %v1785_v21 = vrot.slane %v1784_v20, 1 }
 0x2de   :  { %v1786_v22 = vadd.f32 %v1785_v21, %v1784_v20 }
 0x2e0   :  { %v1788_v23 = vmul.f32 0.125, %v1786_v22 }
 0x2e2   :  { %v1790_v24 = vsub.f32 %v1774_v13, %v1788_v23 }
 0x2e4   :  { %v1791_v25 = vmul.f32 %v1790_v24, %v1790_v24 }
 0x2e6   :  { %v1792_v26 = vrot.slane %v1791_v25, 4 }
 0x2e8   :  { %v1793_v27 = vadd.f32 %v1792_v26, %v1791_v25 }
 0x2ea   :  { %v1794_v28 = vrot.slane %v1793_v27, 2 }
 0x2ec   :  { %v1795_v29 = vadd.f32 %v1794_v28, %v1793_v27 }
 0x2ee   :  { %v1796_v42 = vrot.slane %v1795_v29, 1 }
 0x2f0   :  { %v1797_v30 = vadd.f32 %v1796_v42, %v1795_v29 }
 0x2f2   :  { %v1799_v31 = vmul.f32 0.125, %v1797_v30 }
 0x2f4   :  { %v1801_v32 = vadd.f32 1e-05, %v1799_v31 }
 0x2f6   :  { %2475 = vrsqrt.f32 %v1801_v32 }
 0x300   :  { %v2476_v34 = vpop.eup %2475 }
 0x301   :  { %v1803_v35 = vmul.f32 %v2476_v34, %v1800_v33 }
 0x303   :  { %v1805_v37 = vmul.f32 %v1803_v35, %v1788_v23  ;;  %v1813_v38 = vrot.slane %v1803_v35, %v2698_v50 }
 0x305   :  { %v1806_v39 = vsub.f32 %v1804_v36, %v1805_v37  ;;  %v1815_v40 = vmul.f32 %v1813_v38, %v1774_v13 }
 0x307   :  { %v1820_v41 = vrot.slane %v1806_v39, %v2698_v50 }
 0x309   :  { %v1822_v43 = vadd.f32 %v1820_v41, %v1815_v40 }
 0x30b   :  { %v1823_v44 = vmax.f32 %v1822_v43, 0.0 }
 0x30d   :  { %2295 = vmatpush3.xpose.msra.mxu1 %v1823_v44 }
 0x310   :  { %2297 = vmatmul.mubr.f32.vlgmr.msra.gmra.mrb[20].mxu1 %v1807_v45 }
 0x3e3   :  { %v1890_v48 = vpop.f32.mrb[20].mxu1 }
 0x3e4   :  { %v1903_v49 = vadd.f32 %v1902_v47, %v1890_v48  ;;  %v2298_v51 = vpop.f32.mrb[21].mxu1 }
 0x3e6   :  { %1905 = vst.msk [vmem:[#allocation11] sm:$0x1] %vm1904_vm3, %v1903_v49 }
 0x3e7   :  { %2554 = shalt.err (!%p2551_p0)
}
 0x3e8   :  { %s2555_s14 = scalar_lea.hbm %s2744_s9, 16 }
 0x3e9   :  { %p2556_p1 = scmp.ne.s32.totalorder %s2744_s9, %s2555_s14  ;;  %p2559_p2 = scmp.lt.u32.totalorder %s2555_s14, %s2744_s9 }
 0x3eb   :  { %p2561_p3 = pnand %p2559_p2, %p2556_p1 }
 0x3ed   :  { %2564 = shalt.err (!%p2561_p3)
}
 0x3ee   :  { %1915 = dma.vmem_to_hbm [thread:$0]  %s1913_s6, 16, %s2744_s9, [#allocation7]  }
 0x3ef   :  { %2569 = dma.done.wait [#allocation7], 16  }
 0x3f0   :  { %2570 = vsyncadd [#allocation7], 4294967280 }
 0x3f1   :  { %1919 = vsyncpa [#allocation6], 1 }
 0x3f2   :  { %1920 = vsyncpa [#allocation9], 1 }
 0x3f3   :  { %1921 = vsyncpa [#allocation7], 1 }

</bundles_post_ra>
